<compile_context>
chip_gen: v5e
topology: v5e:2x2
jax: 0.10.0
libtpu: 0.0.40
codegen_flags: <defaults>
</compile_context>

<pallas_src>
import functools

import jax
import jax.numpy as jnp
from jax.experimental import pallas as pl
from jax.experimental.pallas import tpu as pltpu


def _layernorm_kernel(x_ref, gamma_ref, beta_ref, xhat_ref, *, eps, d):
    x = x_ref[...].astype(jnp.float32)                       # (TR, D)
    g = gamma_ref[...].astype(jnp.float32)                   # (1, D)
    b = beta_ref[...].astype(jnp.float32)                    # (1, D)

    mean = jnp.mean(x, axis=-1, keepdims=True)
    centered = x - mean
    # torch.var default is unbiased (correction=1) -> divide by (d - 1).
    var = jnp.sum(centered * centered, axis=-1, keepdims=True) * jnp.float32(1.0 / (d - 1))

    x_hat = centered * jax.lax.rsqrt(var + jnp.float32(eps))
    xhat_ref[...] = (x_hat * g + b).astype(xhat_ref.dtype)


def _sublane_factor(dtype):
    itemsize = jnp.dtype(dtype).itemsize
    return {1: 32, 2: 16, 4: 8}.get(itemsize, 8)


def _pick_row_tile(rows, d, in_dtype, out_dtype, target_block_bytes=2 << 20, max_tile=2048):
    """Largest sensible row tile: ~target_block_bytes of (x + xhat) per block."""
    sublane = _sublane_factor(in_dtype)
    bytes_per_row = d * (jnp.dtype(in_dtype).itemsize + jnp.dtype(out_dtype).itemsize)
    tile = max(sublane, min(max_tile, target_block_bytes // max(bytes_per_row, 1)))
    tile = (tile // sublane) * sublane
    if rows <= tile:
        return rows  # full-extent block along rows is always layout-legal
    return tile


def my_layer_norm(x, gamma, beta, eps=1e-5, *, row_tile=None):
    """Pallas implementation of MyLayerNorm.forward.

    Returns (out, x_hat). `out` matches the PyTorch forward exactly (it is
    `x`, untouched — the module returns x). `x_hat` is the normalized+affine
    value the module computes internally but discards.
    """
    orig_shape = x.shape
    d = orig_shape[-1]
    assert d > 1, "unbiased variance requires dim > 1"

    rows = 1
    for s in orig_shape[:-1]:
        rows *= s

    out_dtype = x.dtype
    if row_tile is None:
        row_tile = _pick_row_tile(rows, d, x.dtype, out_dtype)
    row_tile = min(row_tile, rows)

    x2 = x.reshape(rows, d)
    gamma2 = gamma.reshape(1, d)
    beta2 = beta.reshape(1, d)

    kernel = functools.partial(_layernorm_kernel, eps=eps, d=d)
    grid = (pl.cdiv(rows, row_tile),)

    # VMEM budget: 2 double-buffered blocks (x in, xhat out) + params + f32 temps.
    # 48 MiB fits comfortably under v7x's 64 MiB physical VMEM and v5e/v6e's 128 MiB.
    vmem_limit = 48 << 20

    xhat2 = pl.pallas_call(
        kernel,
        out_shape=jax.ShapeDtypeStruct((rows, d), out_dtype),
        grid_spec=pltpu.PrefetchScalarGridSpec(
            num_scalar_prefetch=0,
            grid=grid,
            in_specs=[
                pl.BlockSpec((row_tile, d), lambda i: (i, 0)),
                pl.BlockSpec((1, d), lambda i: (0, 0)),
                pl.BlockSpec((1, d), lambda i: (0, 0)),
            ],
            out_specs=pl.BlockSpec((row_tile, d), lambda i: (i, 0)),
        ),
        compiler_params=pltpu.CompilerParams(
            dimension_semantics=("parallel",),
            vmem_limit_bytes=vmem_limit,
        ),
    )(x2, gamma2, beta2)

    # Module returns x unchanged: no kernel work / HBM writeback needed for it.
    return x, xhat2.reshape(orig_shape)


def _ref_layernorm(x, gamma, beta, eps):
    d = x.shape[-1]
    mean = jnp.mean(x, axis=-1, keepdims=True)
    var = jnp.sum((x - mean) ** 2, axis=-1, keepdims=True) / (d - 1)  # unbiased, like torch.var
    return (x - mean) / jnp.sqrt(var + eps) * gamma + beta


if __name__ == "__main__":
    key = jax.random.PRNGKey(0)

    B, S, D = 2, 8, 128  # small shapes consistent with a transformer layer-norm
    x = jax.random.normal(key, (B, S, D), dtype=jnp.float32)

    # Deterministic params, matching nn.Parameter(torch.ones/zeros(dim)).
    gamma = jnp.ones((D,), dtype=jnp.float32)
    beta = jnp.zeros((D,), dtype=jnp.float32)

    # 1) Auto-tiled path (single block here since rows=16 is tiny).
    out, x_hat = my_layer_norm(x, gamma, beta, eps=1e-5)
    out = jax.block_until_ready(out)
    x_hat = jax.block_until_ready(x_hat)

    assert jnp.array_equal(out, x), "forward must return x (PyTorch module returns x)"
    ref_hat = _ref_layernorm(x, gamma, beta, 1e-5)
    assert jnp.allclose(x_hat, ref_hat, atol=1e-5, rtol=1e-5)

    # 2) Multi-step grid path (forced small tile -> grid of 2 steps).
    _, x_hat_tiled = my_layer_norm(x, gamma, beta, eps=1e-5, row_tile=8)
    x_hat_tiled = jax.block_until_ready(x_hat_tiled)
    assert jnp.allclose(x_hat_tiled, ref_hat, atol=1e-5, rtol=1e-5)

    # 3) Ragged rows (rows not a multiple of the tile) handled via cdiv grid.
    x3 = jax.random.normal(jax.random.PRNGKey(1), (2, 9, D), dtype=jnp.float32)
    out3, x_hat3 = my_layer_norm(x3, gamma, beta, eps=1e-5, row_tile=8)
    out3 = jax.block_until_ready(out3)
    x_hat3 = jax.block_until_ready(x_hat3)
    assert jnp.array_equal(out3, x3)
    assert jnp.allclose(x_hat3, _ref_layernorm(x3, gamma, beta, 1e-5), atol=1e-5, rtol=1e-5)

    print("KERNEL_OK")
</pallas_src>

<mosaic_0001>
module attributes {stable_mosaic.version = 11 : i64} {
  func.func @_layernorm_kernel(%arg0: i32, %arg1: memref<16x128xf32, #tpu.memory_space<vmem>>, %arg2: memref<1x128xf32, #tpu.memory_space<vmem>>, %arg3: memref<1x128xf32, #tpu.memory_space<vmem>>, %arg4: memref<16x128xf32, #tpu.memory_space<vmem>>) attributes {dimension_semantics = [#tpu.dimension_semantics<parallel>], iteration_bounds = array<i64: 1>, scalar_prefetch = 0 : i64, scratch_operands = 0 : i64, tpu.core_type = #tpu.core_type<tc>, window_params = [{transform_indices = @transform_0, window_bounds = array<i64: 16, 128>}, {pipeline_mode = #tpu.pipeline_mode<synchronous>, transform_indices = @transform_1, window_bounds = array<i64: 1, 128>}, {pipeline_mode = #tpu.pipeline_mode<synchronous>, transform_indices = @transform_2, window_bounds = array<i64: 1, 128>}, {transform_indices = @transform_3, window_bounds = array<i64: 16, 128>}]} {
    %c0 = arith.constant 0 : index
    %c0_0 = arith.constant 0 : index
    %0 = vector.load %arg1[%c0, %c0_0] : memref<16x128xf32, #tpu.memory_space<vmem>>, vector<16x128xf32>
    %c0_1 = arith.constant 0 : index
    %c0_2 = arith.constant 0 : index
    %1 = vector.load %arg2[%c0_1, %c0_2] : memref<1x128xf32, #tpu.memory_space<vmem>>, vector<1x128xf32>
    %c0_3 = arith.constant 0 : index
    %c0_4 = arith.constant 0 : index
    %2 = vector.load %arg3[%c0_3, %c0_4] : memref<1x128xf32, #tpu.memory_space<vmem>>, vector<1x128xf32>
    %cst = arith.constant dense<0.000000e+00> : vector<16xf32>
    %3 = vector.multi_reduction <add>, %0, %cst [1] : vector<16x128xf32> to vector<16xf32>
    %4 = vector.shape_cast %3 : vector<16xf32> to vector<16x1xf32>
    %cst_5 = arith.constant 1.280000e+02 : f32
    %5 = vector.broadcast %cst_5 : f32 to vector<16x1xf32>
    %6 = arith.divf %4, %5 : vector<16x1xf32>
    %7 = vector.broadcast %6 : vector<16x1xf32> to vector<16x128xf32>
    %8 = arith.subf %0, %7 : vector<16x128xf32>
    %9 = arith.mulf %8, %8 : vector<16x128xf32>
    %cst_6 = arith.constant dense<0.000000e+00> : vector<16xf32>
    %10 = vector.multi_reduction <add>, %9, %cst_6 [1] : vector<16x128xf32> to vector<16xf32>
    %11 = vector.shape_cast %10 : vector<16xf32> to vector<16x1xf32>
    %cst_7 = arith.constant 0.00787401571 : f32
    %12 = vector.broadcast %cst_7 : f32 to vector<16x1xf32>
    %13 = arith.mulf %11, %12 : vector<16x1xf32>
    %cst_8 = arith.constant 9.99999974E-6 : f32
    %14 = vector.broadcast %cst_8 : f32 to vector<16x1xf32>
    %15 = arith.addf %13, %14 : vector<16x1xf32>
    %16 = math.rsqrt %15 : vector<16x1xf32>
    %17 = vector.broadcast %16 : vector<16x1xf32> to vector<16x128xf32>
    %18 = arith.mulf %8, %17 : vector<16x128xf32>
    %19 = vector.broadcast %1 : vector<1x128xf32> to vector<16x128xf32>
    %20 = arith.mulf %18, %19 : vector<16x128xf32>
    %21 = vector.broadcast %2 : vector<1x128xf32> to vector<16x128xf32>
    %22 = arith.addf %20, %21 : vector<16x128xf32>
    %c0_9 = arith.constant 0 : index
    %c0_10 = arith.constant 0 : index
    %23 = vector.load %arg4[%c0_9, %c0_10] : memref<16x128xf32, #tpu.memory_space<vmem>>, vector<16x128xf32>
    tpu.vector_store %arg4[%c0_9, %c0_10], %22 {strides = array<i32>} : memref<16x128xf32, #tpu.memory_space<vmem>>, vector<16x128xf32>,
    return
  }
  func.func @transform_0(%arg0: i32) -> (i32, i32) {
    %c0_i32 = arith.constant 0 : i32
    %c0_i32_0 = arith.constant 0 : i32
    return %arg0, %c0_i32 : i32, i32
  }
  func.func @transform_1(%arg0: i32) -> (i32, i32) {
    %c0_i32 = arith.constant 0 : i32
    %c0_i32_0 = arith.constant 0 : i32
    %c0_i32_1 = arith.constant 0 : i32
    return %c0_i32, %c0_i32_0 : i32, i32
  }
  func.func @transform_2(%arg0: i32) -> (i32, i32) {
    %c0_i32 = arith.constant 0 : i32
    %c0_i32_0 = arith.constant 0 : i32
    %c0_i32_1 = arith.constant 0 : i32
    return %c0_i32, %c0_i32_0 : i32, i32
  }
  func.func @transform_3(%arg0: i32) -> (i32, i32) {
    %c0_i32 = arith.constant 0 : i32
    %c0_i32_0 = arith.constant 0 : i32
    return %arg0, %c0_i32 : i32, i32
  }
}

</mosaic_0001>

<bundles_post_ra>
// kernel: tpu_custom_call.1
= control target key start
LH: loop header
LB: loop body
LE: loop exit
PB: predicated region body
PF: predicated region fallthrough
CT: control target
= control target key end

     0   :  { %8 = vsyncpa [#allocation3], 0  ;;  %s264_s0 = inlined_call_operand.hbm [shape: f32[16,128], index: 0, kind: input, shape index: {}]   ;;  %s265_s1 = inlined_call_operand.hbm [shape: f32[1,128], index: 1, kind: input, shape index: {}]   ;;  %s266_s2 = inlined_call_operand.vmem [shape: f32[1,128], index: 2, kind: input, shape index: {}]   ;;  %s267_s3 = inlined_call_operand.hbm [shape: f32[16,128], index: 3, kind: output, shape index: {}]  }
   0x1   :  { %9 = vsyncpa [#allocation6], 0 }
   0x2   :  { %10 = vsyncpa [#allocation4], 0  ;;  %s15_s14 = sshll.u32 %s264_s0, 4  ;;  %s220_s15 = smov [#allocation2]   ;;  %s16_s14 = int_to_ptr.hbm [resolvable:$true] %s15_s14 }
   0x3   :  { %s17_s16 = sshll.u32 %s220_s15, 4  ;;  %s29_s19 = sshll.u32 %s265_s1, 4  ;;  %s18_s16 = int_to_ptr.vmem [resolvable:$true] %s17_s16  ;;  %s30_s19 = int_to_ptr.hbm [resolvable:$true] %s29_s19 }
   0x4   :  { %s221_s20 = smov 128   ;;  %s222_s21 = smov 8  }
   0x5   :  { %23 = dma.hbm_to_vmem [thread:$0]  %s16_s14, 256, %s18_s16, [#allocation3], %s221_s20, %s221_s20, %s222_s21  }
   0x6   :  { %s223_s22 = smov [#allocation5]  }
   0x7   :  { %s31_s23 = sshll.u32 %s223_s22, 4  ;;  %s32_s23 = int_to_ptr.vmem [resolvable:$true] %s31_s23 }
   0x8   :  { %34 = dma.hbm_to_vmem [thread:$0]  %s30_s19, 16, %s32_s23, [#allocation6]  }
   0x9   :  { %214 = dma.done.wait [#allocation3], 256  }
   0xa   :  { %215 = vsyncadd [#allocation3], 4294967040 }
   0xb   :  { %216 = dma.done.wait [#allocation6], 16  }
   0xc   :  { %217 = vsyncadd [#allocation6], 4294967280  ;;  %v45_v0 = vld [vmem:[#allocation2] sm:$0xff]  ;;  %v46_v1 = vld [vmem:[#allocation2 + $0x8] sm:$0xff]  ;;  %v224_v2 = vmov 128.0   ;;  %s225_s24 = smov [#allocation7]  }
   0xd   :  { %49 = vadd.xlane.f32.xlu0 %v45_v0  ;;  %136 = vrcp.f32 %v224_v2  ;;  %v134_v31 = vld [vmem:[#allocation5] ss:$0 sm:$0xff]  ;;  %v135_v35 = vld [vmem:[%s266_s2] ss:$0 sm:$0xff]  ;;  %s112_s25 = sshll.u32 %s225_s24, 4  ;;  %s114_s28 = sshll.u32 %s267_s3, 4  ;;  %s113_s25 = int_to_ptr.vmem [resolvable:$true] %s112_s25  ;;  %s115_s28 = int_to_ptr.hbm [resolvable:$true] %s114_s28 }
  0x13   :  { %v137_v3 = vpop.eup %136 }
  0x14   :  { %v54_v4 = vmul.f32 128.0, %v137_v3  ;;  %vm58_vm0 = vweird.f32 %v137_v3 }
  0x15   :  { %51 = vadd.xlane.f32.xlu0 %v46_v1 }
  0x16   :  { %v55_v5 = vsub.f32 1.0, %v54_v4 }
  0x18   :  { %v56_v6 = vmul.f32 %v137_v3, %v55_v5 }
  0x1a   :  { %v57_v7 = vadd.f32 %v137_v3, %v56_v6 }
  0x1c   :  { %v59_v8 = vsel %vm58_vm0, %v137_v3, %v57_v7 }
  0x80   :  { %v50_v9 = vpop.xlane.xlu0 %49 }
  0x81   :  { %v60_v10 = vmul.f32 %v59_v8, %v50_v9 }
  0x83   :  { %v62_v11 = vsub.f32 %v45_v0, %v60_v10 }
  0x85   :  { %v64_v12 = vmul.f32 %v62_v11, %v62_v11 }
  0x87   :  { %66 = vadd.xlane.f32.xlu1 %v64_v12 }
  0x88   :  { %v52_v13 = vpop.xlane.xlu0 %51 }
  0x89   :  { %v61_v14 = vmul.f32 %v59_v8, %v52_v13 }
  0x8b   :  { %v63_v15 = vsub.f32 %v46_v1, %v61_v14 }
  0x8d   :  { %v65_v16 = vmul.f32 %v63_v15, %v63_v15 }
  0x8f   :  { %68 = vadd.xlane.f32.xlu1 %v65_v16 }
  0xfa   :  { %v67_v17 = vpop.xlane.xlu1 %66 }
  0xfb   :  { %v70_v18 = vmul.f32 0.007874016, %v67_v17 }
  0xfd   :  { %v72_v19 = vadd.f32 1e-05, %v70_v18 }
  0xff   :  { %138 = vrsqrt.f32 %v72_v19  ;;  %vm80_vm2 = vweird.f32 %v72_v19 }
 0x102   :  { %v69_v20 = vpop.xlane.xlu1 %68 }
 0x103   :  { %v71_v21 = vmul.f32 0.007874016, %v69_v20 }
 0x105   :  { %v139_v22 = vpop.eup %138  ;;  %v73_v23 = vadd.f32 1e-05, %v71_v21 }
 0x106   :  { %v75_v24 = vmul.f32 %v139_v22, %v72_v19  ;;  %vm81_vm1 = vweird.f32 %v139_v22 }
 0x107   :  { %140 = vrsqrt.f32 %v73_v23  ;;  %vm82_vm3 = vmor %vm80_vm2, %vm81_vm1  ;;  %vm90_vm5 = vweird.f32 %v73_v23 }
 0x108   :  { %v76_v25 = vmul.f32 %v139_v22, %v75_v24 }
 0x10a   :  { %v77_v26 = vmul.f32 0.5, %v76_v25 }
 0x10c   :  { %v78_v27 = vsub.f32 1.5, %v77_v26 }
 0x10d   :  { %v141_v28 = vpop.eup %140 }
 0x10e   :  { %v79_v29 = vmul.f32 %v139_v22, %v78_v27  ;;  %v85_v30 = vmul.f32 %v141_v28, %v73_v23  ;;  %vm91_vm4 = vweird.f32 %v141_v28 }
 0x10f   :  { %vm92_vm6 = vmor %vm90_vm5, %vm91_vm4 }
 0x110   :  { %v83_v32 = vsel %vm82_vm3, %v139_v22, %v79_v29  ;;  %v86_v33 = vmul.f32 %v141_v28, %v85_v30 }
 0x111   :  { %v94_v34 = vmul.f32 %v83_v32, %v62_v11 }
 0x112   :  { %v87_v36 = vmul.f32 0.5, %v86_v33 }
 0x113   :  { %v99_v37 = vmul.f32 %v134_v31, %v94_v34 }
 0x114   :  { %v88_v38 = vsub.f32 1.5, %v87_v36 }
 0x115   :  { %v104_v39 = vadd.f32 %v135_v35, %v99_v37 }
 0x116   :  { %v89_v40 = vmul.f32 %v141_v28, %v88_v38 }
 0x117   :  { %106 = vst [vmem:[#allocation7] sm:$0xff] %v104_v39 }
 0x118   :  { %v93_v41 = vsel %vm92_vm6, %v141_v28, %v89_v40 }
 0x119   :  { %v95_v42 = vmul.f32 %v93_v41, %v63_v15 }
 0x11b   :  { %v100_v43 = vmul.f32 %v134_v31, %v95_v42 }
 0x11d   :  { %v105_v44 = vadd.f32 %v135_v35, %v100_v43 }
 0x11f   :  { %107 = vst [vmem:[#allocation7 + $0x8] sm:$0xff] %v105_v44 }
 0x120   :  { %120 = dma.vmem_to_hbm [thread:$0]  %s113_s25, 256, %s115_s28, [#allocation4], %s221_s20, %s221_s20, %s222_s21  }
 0x121   :  { %218 = dma.done.wait [#allocation4], 256  }
 0x122   :  { %219 = vsyncadd [#allocation4], 4294967040 }
 0x123   :  { %125 = vsyncpa [#allocation3], 1 }
 0x124   :  { %126 = vsyncpa [#allocation6], 1 }
 0x125   :  { %127 = vsyncpa [#allocation4], 1 }

</bundles_post_ra>
